<compile_context>
chip_gen: v5e
topology: v5e:2x2
jax: 0.10.0
libtpu: 0.0.40
codegen_flags: <defaults>
</compile_context>

<pallas_src>
import math

import jax
import jax.numpy as jnp
from jax.experimental import pallas as pl
from jax.experimental.pallas import tpu as pltpu


def _copy_kernel(x_ref, o_ref):
    # Identity copy of one (tile_n, tile_f) block; reshape has no arithmetic.
    o_ref[...] = x_ref[...]


def _resolve_target_shape(in_shape, target_shape):
    """Resolve a possible -1 in target_shape (torch.reshape semantics)."""
    feat = math.prod(in_shape[1:])
    tgt = [int(t) for t in target_shape]
    neg = [i for i, t in enumerate(tgt) if t == -1]
    if neg:
        known = math.prod(t for t in tgt if t != -1)
        tgt[neg[0]] = feat // known
    assert math.prod(tgt) == feat, "target_shape incompatible with input size"
    return tuple(tgt)


def _largest_aligned_divisor(extent, align, cap):
    """Largest divisor of `extent` that is a multiple of `align` and <= cap.

    Returns `extent` itself when no aligned divisor exists (full-extent blocks
    are always legal for BlockSpec).
    """
    if extent % align != 0:
        return extent
    best = align
    cap = max(align, min(cap, extent))
    t = cap - (cap % align)
    while t >= align:
        if extent % t == 0:
            best = t
            break
        t -= align
    return best


def reshape_forward(x, target_shape, *,
                    max_tile_lanes=4096,
                    max_tile_sublanes=512,
                    tile_vmem_budget_bytes=4 * 1024 * 1024):
    """Pallas implementation of Reshape: (N, ...) -> (N, *target_shape)."""
    N = x.shape[0]
    F = math.prod(x.shape[1:]) if x.ndim > 1 else 1
    tgt = _resolve_target_shape(x.shape, target_shape)

    # Flat 2-D view: row-major element order is identical before and after the
    # reshape (batch dim preserved), so copying this view IS the reshape.
    x2 = x.reshape(N, F)

    itemsize = jnp.dtype(x.dtype).itemsize

    # Lane axis (last dim): multiples of 128 so stores are unmasked vst's.
    tile_f = _largest_aligned_divisor(F, 128, max_tile_lanes)

    # Sublane axis (batch dim): multiples of 8, capped so that the
    # double-buffered (in + out) tiles stay well inside scoped VMEM
    # (conservative for v5e/v6e/v7x defaults).
    rows_budget = max(8, tile_vmem_budget_bytes // max(1, tile_f * itemsize))
    tile_n = _largest_aligned_divisor(N, 8, min(max_tile_sublanes, rows_budget))

    grid = (pl.cdiv(N, tile_n), pl.cdiv(F, tile_f))

    out2 = pl.pallas_call(
        _copy_kernel,
        out_shape=jax.ShapeDtypeStruct((N, F), x.dtype),
        grid=grid,
        in_specs=[pl.BlockSpec((tile_n, tile_f), lambda i, j: (i, j))],
        out_specs=pl.BlockSpec((tile_n, tile_f), lambda i, j: (i, j)),
        compiler_params=pltpu.CompilerParams(
            dimension_semantics=("parallel", "parallel"),
        ),
    )(x2)

    # Metadata-only reshape to the requested target shape.
    return out2.reshape((N,) + tgt)


if __name__ == "__main__":
    # Reshape(target_shape=(16, 8, 8)) applied to x of shape (2, 4, 16, 16):
    # 4*16*16 == 16*8*8 == 1024 elements per batch item.
    N, C, H, W = 2, 4, 16, 16
    target_shape = (16, 8, 8)

    key = jax.random.PRNGKey(0)
    x = jax.random.normal(key, (N, C, H, W), dtype=jnp.float32)

    # Smaller lane cap here so the tiny example still exercises a multi-step
    # pipelined grid (grid = (1, 4)) while remaining lane-dense (256 % 128 == 0).
    out = reshape_forward(x, target_shape, max_tile_lanes=256)
    out = jax.block_until_ready(out)

    ref = jnp.reshape(x, (N,) + target_shape)
    assert out.shape == (N,) + target_shape, f"bad shape {out.shape}"
    assert out.dtype == x.dtype
    assert jnp.array_equal(out, ref), "mismatch vs reference reshape"

    print("KERNEL_OK")
</pallas_src>

<mosaic_0001>
module attributes {stable_mosaic.version = 11 : i64} {
  func.func @_copy_kernel(%arg0: i32, %arg1: i32, %arg2: memref<2x256xf32, #tpu.memory_space<vmem>>, %arg3: memref<2x256xf32, #tpu.memory_space<vmem>>) attributes {dimension_semantics = [#tpu.dimension_semantics<parallel>, #tpu.dimension_semantics<parallel>], iteration_bounds = array<i64: 1, 4>, scalar_prefetch = 0 : i64, scratch_operands = 0 : i64, tpu.core_type = #tpu.core_type<tc>, window_params = [{transform_indices = @transform_0, window_bounds = array<i64: 2, 256>}, {transform_indices = @transform_1, window_bounds = array<i64: 2, 256>}]} {
    %c0 = arith.constant 0 : index
    %c0_0 = arith.constant 0 : index
    %0 = vector.load %arg2[%c0, %c0_0] : memref<2x256xf32, #tpu.memory_space<vmem>>, vector<2x256xf32>
    %c0_1 = arith.constant 0 : index
    %c0_2 = arith.constant 0 : index
    %1 = vector.load %arg3[%c0_1, %c0_2] : memref<2x256xf32, #tpu.memory_space<vmem>>, vector<2x256xf32>
    tpu.vector_store %arg3[%c0_1, %c0_2], %0 {strides = array<i32>} : memref<2x256xf32, #tpu.memory_space<vmem>>, vector<2x256xf32>,
    return
  }
  func.func @transform_0(%arg0: i32, %arg1: i32) -> (i32, i32) {
    %c0_i32 = arith.constant 0 : i32
    return %arg0, %arg1 : i32, i32
  }
  func.func @transform_1(%arg0: i32, %arg1: i32) -> (i32, i32) {
    %c0_i32 = arith.constant 0 : i32
    return %arg0, %arg1 : i32, i32
  }
}

</mosaic_0001>

<bundles_post_ra>
// kernel: tpu_custom_call.1
= control target key start
LH: loop header
LB: loop body
LE: loop exit
PB: predicated region body
PF: predicated region fallthrough
CT: control target
= control target key end

     0   :  { %6 = vsyncpa [#allocation3], 0  ;;  %s581_s0 = inlined_call_operand.hbm [shape: f32[2,1024], index: 0, kind: input, shape index: {}]   ;;  %s582_s1 = inlined_call_operand.hbm [shape: f32[2,1024], index: 1, kind: output, shape index: {}]  }
   0x1   :  { %8 = vsyncpa [#allocation3 + $0x1], 0 }
   0x2   :  { %9 = vsyncpa [#allocation4], 0 }
   0x3   :  { %11 = vsyncpa [#allocation4 + $0x1], 0  ;;  %s463_s6 = smov 0   ;;  %s465_s7 = smov 0  }
   0x4   :  { %s467_s8 = smov 0   ;;  %s469_s9 = smov 0  }
   0x5   :  { %s471_s10 = smov 0   ;;  %s473_s11 = smov 0  }
   0x6 LB: > { %s260_s12 = sadd.s32 4294967295, %s451_s11   ;;  %s261_s13 = sadd.s32 4294967294, %s451_s11   ;;  %s451_s11 = sphi %s473_s11, %s17_s11   ;;  %s447_s10 = sphi %s471_s10, %s591_s10   ;;  %s443_s9 = sphi %s469_s9, %s590_s9   ;;  %s439_s8 = sphi %s467_s8, %s589_s8   ;;  %s435_s7 = sphi %s465_s7, %s588_s7   ;;  %s431_s6 = sphi %s463_s6, %s587_s6  }
   0x7   : > { %s26_s14 = sadd.s32 1, %s447_s10  ;;  %s38_s15 = sadd.s32 1, %s439_s8 }
   0x8   : > { %p27_p0 = scmp.ge.s32.totalorder %s26_s14, 4  ;;  %p45_p1 = scmp.ne.s32.totalorder %s439_s8, %s435_s7 }
   0x9   : > { %p46_p2 = scmp.eq.s32.totalorder %s451_s11, 0  ;;  %p51_p3 = scmp.ne.s32.totalorder %s435_s7, %s431_s6 }
   0xa   : > { %s593_s14 = smov (%p27_p0, %s26_s14), 0  ;;  %p52_p5 = scmp.eq.s32.totalorder %s260_s12, 0 }
   0xb   : > { %p504_p4 = por %p46_p2, %p45_p1  ;;  %s34_s17 = ssub.s32 %s447_s10, %s593_s14 }
   0xc   : > { %p77_p6 = scmp.eq.s32.totalorder %s260_s12, 3  ;;  %p36_p7 = scmp.eq.s32.totalorder %s34_s17, 0 }
   0xd   : > { %p510_p8 = por %p52_p5, %p51_p3  ;;  %p83_p10 = scmp.eq.s32.totalorder %s261_s13, 3 }
   0xe   : > { %p514_p9 = por %p77_p6, %p45_p1  ;;  %p289_p12 = scmp.lt.s32.totalorder %s451_s11, 4 }
   0xf   : > { %s519_s20 = scalar_select %p36_p7, %s439_s8, %s38_s15  }
  0x10   : > { %p521_p11 = por %p83_p10, %p51_p3  ;;  %s103_s22 = sand.u32 1, %s439_s8  }
  0x11   : > { %s264_s23 = sshll.u32 %s103_s22, 2  ;;  %s275_s24 = sshll.u32 %s447_s10, 2 }
  0x12   : > { %s114_s27 = scalar_lea.hbm %s581_s0, %s275_s24  ;;  %s107_s28 = scalar_lea.vmem [#allocation2], %s264_s23 }
  0x13   : > { %s118_s29 = sshll.u32 %s107_s28, 4  ;;  %s116_s30 = sshll.u32 %s114_s27, 4  ;;  %s119_s29 = int_to_ptr.vmem [resolvable:$true] %s118_s29  ;;  %s117_s30 = int_to_ptr.hbm [resolvable:$true] %s116_s30 }
  0x14   : > { %p282_p13 = pnand %p289_p12, %p504_p4  ;;  %p267_p0 = scmp.ge.s32.totalorder %s451_s11, 1 }
  0x15   : > { %p123_p1 = scmp.lt.s32.totalorder %s451_s11, 5  ;;  %s104_s2 = scalar_lea.sflag [#allocation3], %s103_s22 }
  0x16   : > { %284 = dma.hbm_to_vmem [thread:$0]  (!%p282_p13), %s117_s30, 64, %s119_s29, %s104_s2  }
  0x17   : > { %p124_p2 = pnand %p267_p0, %p123_p1 }
  0x18   : > { %s536_s3 = sand.u32 (!%p124_p2), 1, %s435_s7  }
  0x19   : > { %127 = sbr.rel (%p124_p2) target bundleno = 46 (0x2e), region = 24  ;;  %s268_s4 = sshll.u32 (!%p124_p2), %s536_s3, 2 }
  0x1a   : > { %s130_s5 = scalar_lea.sflag (!%p124_p2), [#allocation3], %s536_s3  ;;  %s133_s12 = scalar_lea.vmem (!%p124_p2), [#allocation2], %s268_s4 }
  0x1e   : > { %422 = dma.done.wait (%p510_p8), %s130_s5, 64  }
  0x1f   : > { %424 = vsyncadd (%p510_p8), %s130_s5, 4294967232  ;;  %s276_s13 = sshll.u32 %s443_s9, 2  ;;  %s152_s22 = scalar_lea.vmem [#allocation5], %s268_s4  ;;  %v155_v0 = vld [vmem:[%s133_s12] sm:$0xf] }
  0x20   : > { %s171_s17 = scalar_lea.hbm %s582_s1, %s276_s13  ;;  %s173_s23 = sshll.u32 %s152_s22, 4  ;;  %156 = vst [vmem:[%s152_s22] sm:$0xf] %v155_v0  ;;  %s174_s23 = int_to_ptr.vmem [resolvable:$true] %s173_s23 }
  0x21   : > { %s175_s24 = sshll.u32 %s171_s17, 4  ;;  %s158_s25 = scalar_lea.sflag [#allocation4], %s536_s3  ;;  %s176_s24 = int_to_ptr.hbm [resolvable:$true] %s175_s24 }
  0x22   : > { %s383_s26 = sshra.s32 %s176_s24, 4  ;;  %s389_s28 = scalar_lea.hbm %s582_s1, 16  ;;  %s384_s26 = int_to_ptr.hbm [resolvable:$true] %s383_s26 }
  0x23   : > { %s385_s18 = scalar_lea.hbm %s384_s26, 4  ;;  %p390_p6 = scmp.lt.s32.totalorder %s384_s26, %s582_s1 }
  0x24   : > { %p386_p3 = scmp.ne.s32.totalorder %s384_s26, %s385_s18  ;;  %p391_p7 = scmp.lt.s32.totalorder %s389_s28, %s385_s18 }
  0x26   : > { %p387_p4 = pnand %p386_p3, %p514_p9  ;;  %p392_p8 = por %p391_p7, %p390_p6 }
  0x28   : > { %p388_p5 = pneg %p387_p4 }
  0x2a   : > { %p393_p10 = pnand %p392_p8, %p388_p5 }
  0x2c   : > { %396 = shalt.err (!%p393_p10)
}
  0x2d   : > { %279 = dma.vmem_to_hbm [thread:$0]  (%p514_p9), %s174_s23, 64, %s176_s24, %s158_s25  }
  0x2e PF: > { %p290_p12 = scmp.ge.s32.totalorder %s451_s11, 2  ;;  %s187_s2 = sand.u32 1, %s431_s6  }
  0x2f   : > { %s188_s3 = scalar_lea.sflag [#allocation4], %s187_s2 }
  0x30   : > { %p286_p13 = pnand %p290_p12, %p521_p11 }
  0x32   : > { %p287_p0 = pneg %p286_p13 }
  0x34   : > { %426 = dma.done.wait (%p287_p0), %s188_s3, 64  }
  0x35   : > { %428 = vsyncadd (%p287_p0), %s188_s3, 4294967232  ;;  %s17_s11 = sadd.s32 1, %s451_s11   ;;  %s587_s6 = smov %s435_s7 }
  0x36   : > { %p14_p1 = scmp.ge.s32.totalorder %s17_s11, 6   ;;  %s588_s7 = smov %s439_s8 }
  0x37   : > { %s589_s8 = smov %s519_s20  ;;  %s590_s9 = smov %s447_s10 }
  0x38   : > { %s591_s10 = smov %s593_s14  ;;  %16 = sbr.rel (!%p14_p1) target bundleno = 6 (0x6), region = 69 }
  0x3d   :  { %194 = vsyncpa [#allocation3], 1 }
  0x3e   :  { %196 = vsyncpa [#allocation3 + $0x1], 1 }
  0x3f   :  { %197 = vsyncpa [#allocation4], 1 }
  0x40   :  { %199 = vsyncpa [#allocation4 + $0x1], 1 }

</bundles_post_ra>
